<compile_context>
chip_gen: v6e
topology: v6e:2x2x1
jax: 0.10.0
libtpu: 0.0.40
codegen_flags: <defaults>
</compile_context>

<pallas_src>
import functools

import jax
import jax.numpy as jnp
from jax.experimental import pallas as pl
from jax.experimental.pallas import tpu as pltpu


LANE = 128                       # TPU vreg lane width
SUBLANE = 8                      # f32 sublane pack
_MAX_BLOCK_ROWS = 1024           # batch rows per block / per fused launch
_VMEM_LIMIT = 32 * 1024 * 1024   # explicit scoped-VMEM cap (safe on v5e/v6e/v7x)
_NEG_INF = float("-inf")


def _round_up(n, m):
    return ((n + m - 1) // m) * m


# ---------------------------------------------------------------------------
# Kernel bodies
# ---------------------------------------------------------------------------

def _mlp_logits(x, w_ref, b_ref, n_obs):
    """4-layer MLP.  x: (TB, n_obs) value; w_ref: (4, F, F) bf16 ref;
    b_ref: (4, 1, F) f32 ref.  Returns f32 logits (TB, F).  Operands go to the
    MXU in bf16, accumulation is f32; bias add / relu stay f32."""
    def dense(h, layer, k_rows=None):
        w = w_ref[layer]                       # (F, F) bf16
        if k_rows is not None and k_rows < w.shape[0]:
            w = w[:k_rows, :]                  # layer 1: narrow K (padded rows are 0)
        return jnp.dot(h.astype(jnp.bfloat16), w,
                       preferred_element_type=jnp.float32) + b_ref[layer]

    h = jnp.maximum(dense(x, 0, n_obs), 0.0)
    h = jnp.maximum(dense(h, 1), 0.0)
    h = jnp.maximum(dense(h, 2), 0.0)
    return dense(h, 3)


def _mask_pad_rows(logits, n_valid, row_offset):
    """Set batch-padding rows to -inf so they do not perturb the dim-0 softmax."""
    row = row_offset + jax.lax.broadcasted_iota(jnp.int32, logits.shape, 0)
    return jnp.where(row < n_valid, logits, _NEG_INF)


def _dqn_fused_kernel(x_ref, w_ref, b_ref, o_ref, *, n_obs, n_valid):
    """Single-launch path: whole batch resident, softmax over dim 0 in-kernel."""
    logits = _mlp_logits(x_ref[...], w_ref, b_ref, n_obs)
    if x_ref.shape[0] > n_valid:               # static: only if rows were padded
        logits = _mask_pad_rows(logits, n_valid, 0)
    m = jnp.max(logits, axis=0, keepdims=True)  # per action column
    e = jnp.exp(logits - m)
    s = jnp.sum(e, axis=0, keepdims=True)
    o_ref[...] = e / s                          # exact: each column sums to 1


def _dqn_stats_kernel(x_ref, w_ref, b_ref, logits_ref, stats_ref, *,
                      n_obs, n_valid, b_pad, tb):
    """Pass 1 (large batch): per-block logits + running per-column (max, sumexp)
    carried in the resident stats output across the 'arbitrary' batch axis
    (online softmax over dim 0)."""
    i = pl.program_id(0)
    logits = _mlp_logits(x_ref[...], w_ref, b_ref, n_obs)
    if b_pad > n_valid:                         # static: only if rows were padded
        logits = _mask_pad_rows(logits, n_valid, i * tb)
    logits_ref[...] = logits

    m_blk = jnp.max(logits, axis=0, keepdims=True)

    @pl.when(i == 0)
    def _init():
        stats_ref[0:1, :] = m_blk
        stats_ref[1:2, :] = jnp.sum(jnp.exp(logits - m_blk), axis=0, keepdims=True)

    @pl.when(i > 0)
    def _update():
        m_prev = stats_ref[0:1, :]
        l_prev = stats_ref[1:2, :]
        m_new = jnp.maximum(m_prev, m_blk)
        l_new = (l_prev * jnp.exp(m_prev - m_new)
                 + jnp.sum(jnp.exp(logits - m_new), axis=0, keepdims=True))
        stats_ref[0:1, :] = m_new
        stats_ref[1:2, :] = l_new


def _dqn_norm_kernel(logits_ref, stats_ref, o_ref):
    """Pass 2: independent per batch block -> 'parallel' axis (both TCs on v7x)."""
    m = stats_ref[0:1, :]
    l = stats_ref[1:2, :]
    o_ref[...] = jnp.exp(logits_ref[...] - m) / l


# ---------------------------------------------------------------------------
# Wrapper
# ---------------------------------------------------------------------------

@functools.partial(jax.jit, static_argnames=("block_b",))
def dqn_forward(x, w_stack, b_stack, *, block_b=None):
    """Fused DQN forward: relu(L1..L3) -> L4 -> softmax over dim=0 (batch axis,
    matching the PyTorch module).

    x:       (B, n_observations), f32 or bf16, NOT lane-padded.
    w_stack: (4, F, F) bf16, b_stack: (4, 1, F) f32  (from stack_params_for_tpu).
    Returns the lane-padded (B, F) probability slab; slice [:, :n_actions] (or
    argmax) where the result is consumed.  Padded action columns are uniform 1/B.
    """
    B, n_obs = x.shape
    F = w_stack.shape[-1]

    tb = _round_up(block_b if block_b is not None else min(B, _MAX_BLOCK_ROWS),
                   SUBLANE)
    b_pad = _round_up(B, tb)
    nb = b_pad // tb
    if b_pad != B:
        # Only when B is not block-aligned; the <= tb-1 extra rows are masked to
        # -inf logits in-kernel so the dim-0 softmax is unaffected.
        x = jnp.pad(x, ((0, b_pad - B), (0, 0)))

    if nb == 1:
        # Small/medium batch: one launch, everything resident in VMEM.
        vmem = pl.BlockSpec(memory_space=pltpu.MemorySpace.VMEM)
        out = pl.pallas_call(
            functools.partial(_dqn_fused_kernel, n_obs=n_obs, n_valid=B),
            out_shape=jax.ShapeDtypeStruct((b_pad, F), jnp.float32),
            in_specs=[vmem, vmem, vmem],
            out_specs=vmem,
            compiler_params=pltpu.CompilerParams(vmem_limit_bytes=_VMEM_LIMIT),
        )(x, w_stack, b_stack)
    else:
        # Large batch: pipelined batch blocks + two-pass softmax (no VMEM
        # ceiling on B).
        logits, stats = pl.pallas_call(
            functools.partial(_dqn_stats_kernel, n_obs=n_obs, n_valid=B,
                              b_pad=b_pad, tb=tb),
            out_shape=(jax.ShapeDtypeStruct((b_pad, F), jnp.float32),
                       jax.ShapeDtypeStruct((2, F), jnp.float32)),
            grid_spec=pltpu.PrefetchScalarGridSpec(
                num_scalar_prefetch=0,
                grid=(nb,),
                in_specs=[pl.BlockSpec((tb, n_obs), lambda i: (i, 0)),
                          pl.BlockSpec((4, F, F), lambda i: (0, 0, 0)),
                          pl.BlockSpec((4, 1, F), lambda i: (0, 0, 0))],
                out_specs=[pl.BlockSpec((tb, F), lambda i: (i, 0)),
                           pl.BlockSpec((2, F), lambda i: (0, 0))]),
            compiler_params=pltpu.CompilerParams(
                dimension_semantics=("arbitrary",),
                vmem_limit_bytes=_VMEM_LIMIT),
        )(x, w_stack, b_stack)

        out = pl.pallas_call(
            _dqn_norm_kernel,
            out_shape=jax.ShapeDtypeStruct((b_pad, F), jnp.float32),
            grid_spec=pltpu.PrefetchScalarGridSpec(
                num_scalar_prefetch=0,
                grid=(nb,),
                in_specs=[pl.BlockSpec((tb, F), lambda i: (i, 0)),
                          pl.BlockSpec((2, F), lambda i: (0, 0))],
                out_specs=pl.BlockSpec((tb, F), lambda i: (i, 0))),
            compiler_params=pltpu.CompilerParams(
                dimension_semantics=("parallel",),
                vmem_limit_bytes=_VMEM_LIMIT),
        )(logits, stats)

    if b_pad != B:
        out = out[:B]
    return out


# ---------------------------------------------------------------------------
# Parameters / reference
# ---------------------------------------------------------------------------

def init_dqn_params(key, n_observations, n_actions, hidden):
    """nn.Linear-style U(-1/sqrt(fan_in), 1/sqrt(fan_in)) init; weights stored
    (in, out) (transpose of PyTorch's (out, in)); f32 (TPU has no f64)."""
    def linear(k, fan_in, fan_out):
        kw, kb = jax.random.split(k)
        bound = 1.0 / jnp.sqrt(float(fan_in))
        w = jax.random.uniform(kw, (fan_in, fan_out), jnp.float32, -bound, bound)
        b = jax.random.uniform(kb, (1, fan_out), jnp.float32, -bound, bound)
        return w, b

    k1, k2, k3, k4 = jax.random.split(key, 4)
    w1, b1 = linear(k1, n_observations, hidden)
    w2, b2 = linear(k2, hidden, hidden)
    w3, b3 = linear(k3, hidden, hidden)
    w4, b4 = linear(k4, hidden, n_actions)
    return (w1, b1, w2, b2, w3, b3, w4, b4)


def stack_params_for_tpu(params):
    """Zero-pad every feature dim to one common lane-aligned F, stack the four
    weights into one (4, F, F) bf16 array and the four biases into one
    (4, 1, F) f32 array.  One-time cost, done outside the per-step call."""
    w1, b1, w2, b2, w3, b3, w4, b4 = params
    dims = (w1.shape[0], w1.shape[1], w2.shape[1], w3.shape[1], w4.shape[1])
    F = _round_up(max(dims), LANE)

    def pad_w(w):
        return jnp.pad(w, ((0, F - w.shape[0]), (0, F - w.shape[1])))

    def pad_b(b):
        return jnp.pad(b, ((0, 0), (0, F - b.shape[1])))

    w_stack = jnp.stack([pad_w(w) for w in (w1, w2, w3, w4)]).astype(jnp.bfloat16)
    b_stack = jnp.stack([pad_b(b) for b in (b1, b2, b3, b4)]).astype(jnp.float32)
    return w_stack, b_stack


def dqn_reference(x, params):
    """Pure-JAX f32 reference of the PyTorch module."""
    w1, b1, w2, b2, w3, b3, w4, b4 = params
    h = jnp.maximum(x @ w1 + b1, 0.0)
    h = jnp.maximum(h @ w2 + b2, 0.0)
    h = jnp.maximum(h @ w3 + b3, 0.0)
    return jax.nn.softmax(h @ w4 + b4, axis=0)


if __name__ == "__main__":
    key = jax.random.PRNGKey(0)
    k_params, k_x1, k_x2 = jax.random.split(key, 3)

    n_observations, n_actions, hidden = 16, 8, 32

    params = init_dqn_params(k_params, n_observations, n_actions, hidden)
    w_stack, b_stack = stack_params_for_tpu(params)

    # --- small batch: single fused launch (grid-less, whole problem in VMEM) ---
    x1 = jax.random.normal(k_x1, (8, n_observations), jnp.float32)
    out1 = jax.block_until_ready(dqn_forward(x1, w_stack, b_stack))
    probs1 = out1[:, :n_actions]            # slice where the result is consumed
    ref1 = dqn_reference(x1, params)
    assert probs1.shape == (8, n_actions)
    assert jnp.allclose(probs1, ref1, atol=2e-2, rtol=2e-2), "fused path mismatch"
    assert jnp.allclose(jnp.sum(probs1, axis=0), 1.0, atol=1e-3)

    # --- larger batch with forced small batch blocks: exercises the pipelined
    #     two-pass (stats + normalize) path, incl. ragged-tail row masking ---
    x2 = jax.random.normal(k_x2, (44, n_observations), jnp.float32)
    out2 = jax.block_until_ready(dqn_forward(x2, w_stack, b_stack, block_b=16))
    probs2 = out2[:, :n_actions]
    ref2 = dqn_reference(x2, params)
    assert probs2.shape == (44, n_actions)
    assert jnp.allclose(probs2, ref2, atol=2e-2, rtol=2e-2), "grid path mismatch"
    assert jnp.allclose(jnp.sum(probs2, axis=0), 1.0, atol=1e-3)

    print("KERNEL_OK")
</pallas_src>

<mosaic_0001>
module attributes {stable_mosaic.version = 11 : i64} {
  func.func @_dqn_fused_kernel(%arg0: memref<8x16xf32, #tpu.memory_space<vmem>>, %arg1: memref<4x128x128xbf16, #tpu.memory_space<vmem>>, %arg2: memref<4x1x128xf32, #tpu.memory_space<vmem>>, %arg3: memref<8x128xf32, #tpu.memory_space<vmem>>) attributes {dimension_semantics = [], scalar_prefetch = 0 : i64, scratch_operands = 0 : i64, tpu.core_type = #tpu.core_type<tc>} {
    %c0 = arith.constant 0 : index
    %c0_0 = arith.constant 0 : index
    %0 = vector.load %arg0[%c0, %c0_0] : memref<8x16xf32, #tpu.memory_space<vmem>>, vector<8x16xf32>
    %c0_1 = arith.constant 0 : index
    %c0_2 = arith.constant 0 : index
    %c0_3 = arith.constant 0 : index
    %1 = vector.load %arg1[%c0_1, %c0_2, %c0_3] : memref<4x128x128xbf16, #tpu.memory_space<vmem>>, vector<1x128x128xbf16>
    %2 = vector.shape_cast %1 : vector<1x128x128xbf16> to vector<128x128xbf16>
    %3 = vector.extract_strided_slice %2 {offsets = [0, 0], sizes = [16, 128], strides = [1, 1]} : vector<128x128xbf16> to vector<16x128xbf16>
    %4 = arith.truncf %0 : vector<8x16xf32> to vector<8x16xbf16>
    %cst = arith.constant dense<0.000000e+00> : vector<8x128xf32>
    %5 = tpu.matmul %4, %3, %cst {dimension_numbers = #tpu.dot_dimension_numbers<[1], [0], [0], [1], [0, 0, 1, 1], [], []>} : vector<8x16xbf16>, vector<16x128xbf16>, vector<8x128xf32> -> vector<8x128xf32>
    %c0_4 = arith.constant 0 : index
    %c0_5 = arith.constant 0 : index
    %c0_6 = arith.constant 0 : index
    %6 = vector.load %arg2[%c0_4, %c0_5, %c0_6] : memref<4x1x128xf32, #tpu.memory_space<vmem>>, vector<1x1x128xf32>
    %7 = vector.shape_cast %6 : vector<1x1x128xf32> to vector<1x128xf32>
    %8 = vector.broadcast %7 : vector<1x128xf32> to vector<8x128xf32>
    %9 = arith.addf %5, %8 : vector<8x128xf32>
    %cst_7 = arith.constant 0.000000e+00 : f32
    %10 = vector.broadcast %cst_7 : f32 to vector<8x128xf32>
    %11 = arith.maximumf %9, %10 : vector<8x128xf32>
    %c1 = arith.constant 1 : index
    %c0_8 = arith.constant 0 : index
    %c0_9 = arith.constant 0 : index
    %12 = vector.load %arg1[%c1, %c0_8, %c0_9] : memref<4x128x128xbf16, #tpu.memory_space<vmem>>, vector<1x128x128xbf16>
    %13 = vector.shape_cast %12 : vector<1x128x128xbf16> to vector<128x128xbf16>
    %14 = arith.truncf %11 : vector<8x128xf32> to vector<8x128xbf16>
    %cst_10 = arith.constant dense<0.000000e+00> : vector<8x128xf32>
    %15 = tpu.matmul %14, %13, %cst_10 {dimension_numbers = #tpu.dot_dimension_numbers<[1], [0], [0], [1], [0, 0, 1, 1], [], []>} : vector<8x128xbf16>, vector<128x128xbf16>, vector<8x128xf32> -> vector<8x128xf32>
    %c1_11 = arith.constant 1 : index
    %c0_12 = arith.constant 0 : index
    %c0_13 = arith.constant 0 : index
    %16 = vector.load %arg2[%c1_11, %c0_12, %c0_13] : memref<4x1x128xf32, #tpu.memory_space<vmem>>, vector<1x1x128xf32>
    %17 = vector.shape_cast %16 : vector<1x1x128xf32> to vector<1x128xf32>
    %18 = vector.broadcast %17 : vector<1x128xf32> to vector<8x128xf32>
    %19 = arith.addf %15, %18 : vector<8x128xf32>
    %cst_14 = arith.constant 0.000000e+00 : f32
    %20 = vector.broadcast %cst_14 : f32 to vector<8x128xf32>
    %21 = arith.maximumf %19, %20 : vector<8x128xf32>
    %c2 = arith.constant 2 : index
    %c0_15 = arith.constant 0 : index
    %c0_16 = arith.constant 0 : index
    %22 = vector.load %arg1[%c2, %c0_15, %c0_16] : memref<4x128x128xbf16, #tpu.memory_space<vmem>>, vector<1x128x128xbf16>
    %23 = vector.shape_cast %22 : vector<1x128x128xbf16> to vector<128x128xbf16>
    %24 = arith.truncf %21 : vector<8x128xf32> to vector<8x128xbf16>
    %cst_17 = arith.constant dense<0.000000e+00> : vector<8x128xf32>
    %25 = tpu.matmul %24, %23, %cst_17 {dimension_numbers = #tpu.dot_dimension_numbers<[1], [0], [0], [1], [0, 0, 1, 1], [], []>} : vector<8x128xbf16>, vector<128x128xbf16>, vector<8x128xf32> -> vector<8x128xf32>
    %c2_18 = arith.constant 2 : index
    %c0_19 = arith.constant 0 : index
    %c0_20 = arith.constant 0 : index
    %26 = vector.load %arg2[%c2_18, %c0_19, %c0_20] : memref<4x1x128xf32, #tpu.memory_space<vmem>>, vector<1x1x128xf32>
    %27 = vector.shape_cast %26 : vector<1x1x128xf32> to vector<1x128xf32>
    %28 = vector.broadcast %27 : vector<1x128xf32> to vector<8x128xf32>
    %29 = arith.addf %25, %28 : vector<8x128xf32>
    %cst_21 = arith.constant 0.000000e+00 : f32
    %30 = vector.broadcast %cst_21 : f32 to vector<8x128xf32>
    %31 = arith.maximumf %29, %30 : vector<8x128xf32>
    %c3 = arith.constant 3 : index
    %c0_22 = arith.constant 0 : index
    %c0_23 = arith.constant 0 : index
    %32 = vector.load %arg1[%c3, %c0_22, %c0_23] : memref<4x128x128xbf16, #tpu.memory_space<vmem>>, vector<1x128x128xbf16>
    %33 = vector.shape_cast %32 : vector<1x128x128xbf16> to vector<128x128xbf16>
    %34 = arith.truncf %31 : vector<8x128xf32> to vector<8x128xbf16>
    %cst_24 = arith.constant dense<0.000000e+00> : vector<8x128xf32>
    %35 = tpu.matmul %34, %33, %cst_24 {dimension_numbers = #tpu.dot_dimension_numbers<[1], [0], [0], [1], [0, 0, 1, 1], [], []>} : vector<8x128xbf16>, vector<128x128xbf16>, vector<8x128xf32> -> vector<8x128xf32>
    %c3_25 = arith.constant 3 : index
    %c0_26 = arith.constant 0 : index
    %c0_27 = arith.constant 0 : index
    %36 = vector.load %arg2[%c3_25, %c0_26, %c0_27] : memref<4x1x128xf32, #tpu.memory_space<vmem>>, vector<1x1x128xf32>
    %37 = vector.shape_cast %36 : vector<1x1x128xf32> to vector<1x128xf32>
    %38 = vector.broadcast %37 : vector<1x128xf32> to vector<8x128xf32>
    %39 = arith.addf %35, %38 : vector<8x128xf32>
    %cst_28 = arith.constant dense<0xFF800000> : vector<128xf32>
    %40 = vector.multi_reduction <maximumf>, %39, %cst_28 [0] : vector<8x128xf32> to vector<128xf32>
    %41 = vector.shape_cast %40 : vector<128xf32> to vector<1x128xf32>
    %42 = vector.broadcast %41 : vector<1x128xf32> to vector<8x128xf32>
    %43 = arith.subf %39, %42 : vector<8x128xf32>
    %44 = math.exp %43 : vector<8x128xf32>
    %cst_29 = arith.constant dense<0.000000e+00> : vector<128xf32>
    %45 = vector.multi_reduction <add>, %44, %cst_29 [0] : vector<8x128xf32> to vector<128xf32>
    %46 = vector.shape_cast %45 : vector<128xf32> to vector<1x128xf32>
    %47 = vector.broadcast %46 : vector<1x128xf32> to vector<8x128xf32>
    %48 = arith.divf %44, %47 : vector<8x128xf32>
    %c0_30 = arith.constant 0 : index
    %c0_31 = arith.constant 0 : index
    %49 = vector.load %arg3[%c0_30, %c0_31] : memref<8x128xf32, #tpu.memory_space<vmem>>, vector<8x128xf32>
    tpu.vector_store %arg3[%c0_30, %c0_31], %48 {strides = array<i32>} : memref<8x128xf32, #tpu.memory_space<vmem>>, vector<8x128xf32>,
    return
  }
}

</mosaic_0001>

<bundles_post_ra>
// kernel: dqn_forward.1
= control target key start
LH: loop header
LB: loop body
LE: loop exit
PB: predicated region body
PF: predicated region fallthrough
CT: control target
= control target key end

     0   :  { %8 = vsyncpa [#allocation3], 0  ;;  %s820_s0 = inlined_call_operand.hbm [shape: f32[8,16], index: 0, kind: input, shape index: {}]   ;;  %s821_s1 = inlined_call_operand.hbm [shape: bf16[4,128,128], index: 1, kind: input, shape index: {}]   ;;  %s822_s2 = inlined_call_operand.hbm [shape: f32[4,1,128], index: 2, kind: input, shape index: {}]   ;;  %s823_s3 = inlined_call_operand.hbm [shape: f32[8,128], index: 3, kind: output, shape index: {}]  }
   0x1   :  { %9 = vsyncpa [#allocation6], 0 }
   0x2   :  { %10 = vsyncpa [#allocation4], 0  ;;  %s745_s12 = smov [#allocation5]  }
   0x3   :  { %s26_s13 = sshll.u32 %s745_s12, 4  ;;  %s27_s13 = int_to_ptr.vmem [resolvable:$true] %s26_s13 }
   0x4   :  { %s667_s14 = scalar_lea.vmem %s27_s13, 4096  ;;  %p672_p1 = scmp.lt.s32.totalorder %s27_s13, %s27_s13 }
   0x5   :  { %p668_p0 = scmp.ne.s32.totalorder %s27_s13, %s667_s14  ;;  %p673_p2 = scmp.lt.s32.totalorder %s667_s14, %s667_s14 }
   0x7   :  { %p674_p3 = por %p673_p2, %p672_p1 }
   0x9   :  { %p675_p4 = pnand %p674_p3, %p668_p0 }
   0xb   :  { %678 = shalt.err (!%p675_p4)
}
   0xc   :  { %s746_s15 = smov 64   ;;  %s747_s16 = smov 4  }
   0xd   :  { %32 = dma.hbm_to_vmem [thread:$0]  %s821_s1, 4096, %s27_s13, [#allocation6], %s746_s15, %s746_s15, %s747_s16  }
   0xe   :  { %s748_s19 = smov [#allocation2]   ;;  %s749_s21 = smov [#allocation7]  }
   0xf   :  { %s17_s20 = sshll.u32 %s748_s19, 4  ;;  %s38_s22 = sshll.u32 %s749_s21, 4  ;;  %s18_s20 = int_to_ptr.vmem [resolvable:$true] %s17_s20  ;;  %s39_s22 = int_to_ptr.vmem [resolvable:$true] %s38_s22 }
  0x10   :  { %s687_s23 = scalar_lea.vmem %s18_s20, 128  ;;  %p692_p6 = scmp.lt.s32.totalorder %s18_s20, %s18_s20 }
  0x11   :  { %p688_p5 = scmp.ne.s32.totalorder %s18_s20, %s687_s23  ;;  %p693_p7 = scmp.lt.s32.totalorder %s687_s23, %s687_s23 }
  0x13   :  { %p694_p8 = por %p693_p7, %p692_p6 }
  0x15   :  { %p695_p9 = pnand %p694_p8, %p688_p5 }
  0x17   :  { %698 = shalt.err (!%p695_p9)
}
  0x18   :  { %20 = dma.hbm_to_vmem [thread:$0]  %s820_s0, 128, %s18_s20, [#allocation3]  }
  0x19   :  { %s707_s26 = scalar_lea.vmem %s39_s22, 64  ;;  %p712_p11 = scmp.lt.s32.totalorder %s39_s22, %s39_s22 }
  0x1a   :  { %p708_p10 = scmp.ne.s32.totalorder %s39_s22, %s707_s26  ;;  %p713_p12 = scmp.lt.s32.totalorder %s707_s26, %s707_s26 }
  0x1c   :  { %p714_p13 = por %p713_p12, %p712_p11 }
  0x1e   :  { %p715_p0 = pnand %p714_p13, %p708_p10 }
  0x20   :  { %718 = shalt.err (!%p715_p0)
}
  0x21   :  { %s750_s1 = smov 16   ;;  %s751_s27 = smov 1  }
  0x22   :  { %44 = dma.hbm_to_vmem [thread:$0]  %s822_s2, 64, %s39_s22, [#allocation6], %s750_s1, %s750_s1, %s751_s27  }
  0x23   :  { %739 = dma.done.wait [#allocation3], 128  }
  0x24   :  { %740 = vsyncadd [#allocation3], 4294967168 }
  0x25   :  { %741 = dma.done.wait [#allocation6], 4160  }
  0x26   :  { %742 = vsyncadd [#allocation6], 4294963136  ;;  %v752_v0 = vmov 0.0   ;;  %vm753_vm0 = vmmov 0   ;;  %v630_v1 = vld [vmem:[#allocation5] sm:$0xff]   ;;  %v55_v2 = vld [vmem:[#allocation2] sm:$0xff] }
  0x27   :  { %554 = vmatprep.subr.bf16.mxu0 %v752_v0  ;;  %556 = vmatprep.mubr.msk.bf16.mxu0 %vm753_vm0, %v752_v0  ;;  %v58_v3 = vpack.c.bf16 %v55_v2, %v55_v2  ;;  %vm72_vm1 = vcmask 130048   ;;  %v631_v4 = vld [vmem:[#allocation5 + $0x78] sm:$0xff]   ;;  %v632_v5 = vld [vmem:[#allocation5 + $0x70] sm:$0xff]   ;;  %v633_v6 = vld [vmem:[#allocation5 + $0x68] sm:$0xff]   ;;  %s754_s0 = smov [#allocation8]  }
  0x28   :  { %560 = vmatprep.subr.bf16.mxu1 %v752_v0  ;;  %576 = vmatprep.mubr.msk.bf16.mxu1 %vm753_vm0, %v752_v0  ;;  %v634_v7 = vld [vmem:[#allocation5 + $0x60] sm:$0xff]   ;;  %v635_v8 = vld [vmem:[#allocation5 + $0x58] sm:$0xff]   ;;  %v636_v9 = vld [vmem:[#allocation5 + $0x50] sm:$0xff]   ;;  %s485_s2 = sshll.u32 %s754_s0, 4  ;;  %s486_s2 = int_to_ptr.vmem [resolvable:$true] %s485_s2 }
  0x29   :  { %555 = vmatpush3.bf16.msra.mxu0 %v630_v1  ;;  %561 = vmatpush3.bf16.msra.mxu1 %v631_v4  ;;  %v637_v10 = vld [vmem:[#allocation5 + $0x48] sm:$0xff]   ;;  %v638_v11 = vld [vmem:[#allocation5 + $0x40] sm:$0xff]   ;;  %v639_v12 = vld [vmem:[#allocation5 + $0xb8] sm:$0xff]   ;;  %s719_s30 = scalar_lea.vmem %s486_s2, 128  ;;  %p724_p2 = scmp.lt.s32.totalorder %s486_s2, %s486_s2 }
  0x2a   :  { %580 = vmatprep.subr.bf16.mxu0 %v752_v0  ;;  %562 = vmatprep.subr.bf16.mxu1 %v752_v0  ;;  %v640_v13 = vld [vmem:[#allocation5 + $0xb0] sm:$0xff]   ;;  %v641_v14 = vld [vmem:[#allocation5 + $0xa8] sm:$0xff]   ;;  %v642_v15 = vld [vmem:[#allocation5 + $0xa0] sm:$0xff]   ;;  %p720_p1 = scmp.ne.s32.totalorder %s486_s2, %s719_s30  ;;  %p725_p3 = scmp.lt.s32.totalorder %s719_s30, %s719_s30 }
  0x2b   :  { %v643_v16 = vld [vmem:[#allocation5 + $0x98] sm:$0xff]   ;;  %v644_v17 = vld [vmem:[#allocation5 + $0x90] sm:$0xff]   ;;  %v495_v18 = vld [vmem:[#allocation7] ss:$0 sm:$0xff] }
  0x2c   :  { %557 = vmatmul.mubr.msk.bf16.vlgmr.msra.gmra.mxu0 %vm72_vm1, %v58_v3  ;;  %v645_v26 = vld [vmem:[#allocation5 + $0x88] sm:$0xff]   ;;  %v646_v27 = vld [vmem:[#allocation5 + $0x80] sm:$0xff]   ;;  %v647_v28 = vld [vmem:[#allocation5 + $0xf8] sm:$0xff]   ;;  %p726_p4 = por %p725_p3, %p724_p2 }
  0x2d   :  { %596 = vmatprep.mubr.msk.bf16.mxu0 %vm753_vm0, %v752_v0  ;;  %563 = vmatpush3.bf16.msra.mxu1 %v632_v5  ;;  %v648_v29 = vld [vmem:[#allocation5 + $0xf0] sm:$0xff]   ;;  %v649_v30 = vld [vmem:[#allocation5 + $0xe8] sm:$0xff]   ;;  %v650_v31 = vld [vmem:[#allocation5 + $0xe0] sm:$0xff]  }
  0x2e   :  { %564 = vmatprep.subr.bf16.mxu1 %v752_v0  ;;  %581 = vmatpush3.bf16.msra.mxu0 %v639_v12  ;;  %v651_v32 = vld [vmem:[#allocation5 + $0xd8] sm:$0xff]   ;;  %v652_v33 = vld [vmem:[#allocation5 + $0xd0] sm:$0xff]   ;;  %v498_v34 = vld [vmem:[#allocation7 + $0x1] ss:$0 sm:$0xff]  ;;  %p727_p5 = pnand %p726_p4, %p720_p1 }
  0x2f   :  { %582 = vmatprep.subr.bf16.mxu0 %v752_v0  ;;  %v653_v42 = vld [vmem:[#allocation5 + $0xc8] sm:$0xff]   ;;  %v654_v43 = vld [vmem:[#allocation5 + $0xc0] sm:$0xff]  }
  0x30   :  { %v507_v44 = vld [vmem:[#allocation7 + $0x2] ss:$0 sm:$0xff]  ;;  %v516_v52 = vld [vmem:[#allocation7 + $0x3] ss:$0 sm:$0xff] }
  0x31   :  { %565 = vmatpush3.bf16.msra.mxu1 %v633_v6 }
  0x32   :  { %566 = vmatprep.subr.bf16.mxu1 %v752_v0  ;;  %583 = vmatpush3.bf16.msra.mxu0 %v640_v13 }
  0x33   :  { %584 = vmatprep.subr.bf16.mxu0 %v752_v0 }
  0x35   :  { %567 = vmatpush3.bf16.msra.mxu1 %v634_v7 }
  0x36   :  { %568 = vmatprep.subr.bf16.mxu1 %v752_v0  ;;  %585 = vmatpush3.bf16.msra.mxu0 %v641_v14 }
  0x37   :  { %586 = vmatprep.subr.bf16.mxu0 %v752_v0 }
  0x39   :  { %569 = vmatpush3.bf16.msra.mxu1 %v635_v8 }
  0x3a   :  { %570 = vmatprep.subr.bf16.mxu1 %v752_v0  ;;  %587 = vmatpush3.bf16.msra.mxu0 %v642_v15 }
  0x3b   :  { %588 = vmatprep.subr.bf16.mxu0 %v752_v0 }
  0x3d   :  { %571 = vmatpush3.bf16.msra.mxu1 %v636_v9 }
  0x3e   :  { %572 = vmatprep.subr.bf16.mxu1 %v752_v0  ;;  %589 = vmatpush3.bf16.msra.mxu0 %v643_v16 }
  0x3f   :  { %590 = vmatprep.subr.bf16.mxu0 %v752_v0 }
  0x41   :  { %573 = vmatpush3.bf16.msra.mxu1 %v637_v10 }
  0x42   :  { %574 = vmatprep.subr.bf16.mxu1 %v752_v0  ;;  %591 = vmatpush3.bf16.msra.mxu0 %v644_v17 }
  0x43   :  { %592 = vmatprep.subr.bf16.mxu0 %v752_v0 }
  0x45   :  { %575 = vmatpush3.bf16.msra.mxu1 %v638_v11 }
  0x46   :  { %600 = vmatprep.subr.bf16.mxu1 %v752_v0  ;;  %593 = vmatpush3.bf16.msra.mxu0 %v645_v26 }
  0x47   :  { %594 = vmatprep.subr.bf16.mxu0 %v752_v0 }
  0x4a   :  { %595 = vmatpush3.bf16.msra.mxu0 %v646_v27 }
  0xec   :  { %v110_v19 = vpop.f32.mrf.mxu0 }
  0xed   :  { %v111_v20 = vadd.f32 %v495_v18, %v110_v19 }
  0xee   :  { %v558_v21 = vpop.f32.mrf.mxu0 }
  0xef   :  { %v116_v22 = vmax.f32 %v111_v20, 0.0 }
  0xf0   :  { %v113_v23 = vpop.f32.mrf.mxu0 }
  0xf1   :  { %v134_v24 = vpack.c.bf16 %v116_v22, %v116_v22 }
  0xf2   :  { %v559_v25 = vpop.f32.mrf.mxu0 }
  0xf3   :  { %577 = vmatmul.mubr.bf16.vlgmr.msra.gmra.mxu1 %v134_v24 }
  0xf4   :  { %616 = vmatprep.mubr.msk.bf16.mxu1 %vm753_vm0, %v752_v0  ;;  %601 = vmatpush3.bf16.msra.mxu1 %v647_v28 }
  0xf5   :  { %602 = vmatprep.subr.bf16.mxu1 %v752_v0 }
  0xf8   :  { %603 = vmatpush3.bf16.msra.mxu1 %v648_v29 }
  0xf9   :  { %604 = vmatprep.subr.bf16.mxu1 %v752_v0 }
  0xfc   :  { %605 = vmatpush3.bf16.msra.mxu1 %v649_v30 }
  0xfd   :  { %606 = vmatprep.subr.bf16.mxu1 %v752_v0 }
 0x100   :  { %607 = vmatpush3.bf16.msra.mxu1 %v650_v31 }
 0x101   :  { %608 = vmatprep.subr.bf16.mxu1 %v752_v0 }
 0x104   :  { %609 = vmatpush3.bf16.msra.mxu1 %v651_v32 }
 0x105   :  { %610 = vmatprep.subr.bf16.mxu1 %v752_v0 }
 0x108   :  { %611 = vmatpush3.bf16.msra.mxu1 %v652_v33 }
 0x109   :  { %612 = vmatprep.subr.bf16.mxu1 %v752_v0 }
 0x10c   :  { %613 = vmatpush3.bf16.msra.mxu1 %v653_v42 }
 0x10d   :  { %614 = vmatprep.subr.bf16.mxu1 %v752_v0 }
 0x110   :  { %615 = vmatpush3.bf16.msra.mxu1 %v654_v43 }
 0x1b3   :  { %v225_v35 = vpop.f32.mrf.mxu1 }
 0x1b4   :  { %v226_v36 = vadd.f32 %v498_v34, %v225_v35 }
 0x1b5   :  { %v578_v37 = vpop.f32.mrf.mxu1 }
 0x1b6   :  { %v231_v38 = vmax.f32 %v226_v36, 0.0 }
 0x1b7   :  { %v228_v39 = vpop.f32.mrf.mxu1 }
 0x1b8   :  { %v249_v40 = vpack.c.bf16 %v231_v38, %v231_v38 }
 0x1b9   :  { %v579_v41 = vpop.f32.mrf.mxu1 }
 0x1ba   :  { %597 = vmatmul.mubr.bf16.vlgmr.msra.gmra.mxu0 %v249_v40 }
 0x27a   :  { %v340_v45 = vpop.f32.mrf.mxu0 }
 0x27b   :  { %v341_v46 = vadd.f32 %v507_v44, %v340_v45 }
 0x27c   :  { %v598_v47 = vpop.f32.mrf.mxu0 }
 0x27d   :  { %v346_v48 = vmax.f32 %v341_v46, 0.0 }
 0x27e   :  { %v343_v49 = vpop.f32.mrf.mxu0 }
 0x27f   :  { %v364_v50 = vpack.c.bf16 %v346_v48, %v346_v48 }
 0x280   :  { %v599_v51 = vpop.f32.mrf.mxu0 }
 0x281   :  { %617 = vmatmul.mubr.bf16.vlgmr.msra.gmra.mxu1 %v364_v50 }
 0x341   :  { %v455_v53 = vpop.f32.mrf.mxu1 }
 0x342   :  { %v456_v54 = vadd.f32 %v516_v52, %v455_v53 }
 0x343   :  { %v618_v55 = vpop.f32.mrf.mxu1 }
 0x344   :  { %v461_v56 = vrot.slane %v456_v54, 4 }
 0x345   :  { %v458_v57 = vpop.f32.mrf.mxu1 }
 0x346   :  { %v462_v58 = vmax.f32 %v456_v54, %v461_v56 }
 0x347   :  { %v619_v59 = vpop.f32.mrf.mxu1 }
 0x348   :  { %v463_v60 = vrot.slane %v462_v58, 2 }
 0x34a   :  { %v464_v61 = vmax.f32 %v462_v58, %v463_v60 }
 0x34c   :  { %v465_v62 = vrot.slane %v464_v61, 1 }
 0x34e   :  { %v466_v63 = vmax.f32 %v464_v61, %v465_v62 }
 0x350   :  { %v467_v0 = vsub.f32 %v456_v54, %v466_v63 }
 0x352   :  { %v468_v1 = vmul.f32 1.442695, %v467_v0 }
 0x354   :  { %655 = vpow2.f32 %v468_v1 }
 0x361   :  { %v656_v2 = vpop.eup %655 }
 0x362   :  { %v470_v3 = vrot.slane %v656_v2, 4 }
 0x364   :  { %v471_v4 = vadd.f32 %v656_v2, %v470_v3 }
 0x366   :  { %v472_v5 = vrot.slane %v471_v4, 2 }
 0x368   :  { %v473_v6 = vadd.f32 %v472_v5, %v471_v4 }
 0x36a   :  { %v474_v7 = vrot.slane %v473_v6, 1 }
 0x36c   :  { %v475_v8 = vadd.f32 %v474_v7, %v473_v6 }
 0x36e   :  { %657 = vrcp.f32 %v475_v8 }
 0x37b   :  { %v658_v9 = vpop.eup %657 }
 0x37c   :  { %v477_v10 = vmul.f32 %v658_v9, %v656_v2 }
 0x37e   :  { %478 = vst [vmem:[#allocation8] sm:$0xff] %v477_v10 }
 0x37f   :  { %730 = shalt.err (!%p727_p5)
}
 0x380   :  { %488 = dma.vmem_to_hbm [thread:$0]  %s486_s2, 128, %s823_s3, [#allocation4]  }
 0x381   :  { %743 = dma.done.wait [#allocation4], 128  }
 0x382   :  { %744 = vsyncadd [#allocation4], 4294967168 }
 0x383   :  { %492 = vsyncpa [#allocation3], 1 }
 0x384   :  { %493 = vsyncpa [#allocation6], 1 }
 0x385   :  { %494 = vsyncpa [#allocation4], 1 }

</bundles_post_ra>
